<compile_context>
chip_gen: v7x
topology: tpu7x:2x2x1
jax: 0.10.0
libtpu: 0.0.40
codegen_flags: <defaults>
</compile_context>

<pallas_src>
import functools

import jax
import jax.numpy as jnp
from jax.experimental import pallas as pl
from jax.experimental.pallas import tpu as pltpu


def _round_up(x, m):
    return ((x + m - 1) // m) * m


def _apply_act(x, act):
    if act == "relu":
        return jnp.maximum(x, 0.0)
    if act == "sigmoid":
        return jax.nn.sigmoid(x)
    if act == "tanh":
        return jnp.tanh(x)
    return x


# --------------------------------------------------------------------------
# Pallas fused conv matmul:  out[n] = act(W @ col[n] + bias)
#   col: (N, K, M)  (M = oh*ow on the lane axis),  W: (Cout, K)
# --------------------------------------------------------------------------
def _choose_tile(M, K, Cout, out_bytes, max_bytes=6 * 1024 * 1024):
    """Pick a lane tile tm (>=128) and padded M; budget A + out double buffers."""
    for tm in (2048, 1024, 512, 256, 128):
        vmem = 2 * tm * (2 * K + out_bytes * Cout)   # bf16 A + out, 2 buffers
        if tm > 128 and vmem > max_bytes:
            continue
        Mp = _round_up(M, tm)
        if (Mp - M) * 4 <= M:                        # <= 25% padding waste
            return tm, Mp
    return 128, _round_up(M, 128)


def _conv_matmul(a, w, bias, act="none", out_dtype=jnp.bfloat16):
    """a: (N, K, M); w: (Cout, K); bias: (Cout,) -> (N, Cout, M)."""
    Nb, K, M = a.shape
    Cout = w.shape[0]
    a = a.astype(jnp.bfloat16)
    w = w.astype(jnp.bfloat16)
    tm, Mp = _choose_tile(M, K, Cout, jnp.dtype(out_dtype).itemsize)
    if Mp != M:
        a = jnp.pad(a, ((0, 0), (0, 0), (0, Mp - M)))
    bias2 = bias.reshape(Cout, 1).astype(jnp.float32)

    def kernel(w_ref, b_ref, a_ref, o_ref):
        acc = jnp.dot(w_ref[...], a_ref[0],
                      preferred_element_type=jnp.float32)   # bf16 MXU, f32 acc
        acc = _apply_act(acc + b_ref[...], act)              # f32 epilogue
        o_ref[0] = acc.astype(o_ref.dtype)

    out = pl.pallas_call(
        kernel,
        out_shape=jax.ShapeDtypeStruct((Nb, Cout, Mp), out_dtype),
        grid=(Nb, Mp // tm),
        in_specs=[
            pl.BlockSpec((Cout, K), lambda n, m: (0, 0)),
            pl.BlockSpec((Cout, 1), lambda n, m: (0, 0)),
            pl.BlockSpec((1, K, tm), lambda n, m: (n, 0, m)),
        ],
        out_specs=pl.BlockSpec((1, Cout, tm), lambda n, m: (n, 0, m)),
        compiler_params=pltpu.CompilerParams(
            dimension_semantics=("parallel", "parallel")),
    )(w, bias2, a)
    if Mp != M:
        out = out[:, :, :M]
    return out


# --------------------------------------------------------------------------
# Single-block fused linear kernel (fc layers / LSTM input projection).
# --------------------------------------------------------------------------
def _linear(a, w_t, bias, act="none"):
    """a: (M, K); w_t: (K, N); bias: (N,) -> f32 (M, N)."""
    M, K = a.shape
    N = w_t.shape[1]
    Mp = _round_up(M, 8)
    a = a.astype(jnp.bfloat16)
    w_t = w_t.astype(jnp.bfloat16)
    if Mp != M:
        a = jnp.pad(a, ((0, Mp - M), (0, 0)))
    bias2 = bias.reshape(1, N).astype(jnp.float32)

    def kernel(a_ref, w_ref, b_ref, o_ref):
        acc = jnp.dot(a_ref[...], w_ref[...], preferred_element_type=jnp.float32)
        o_ref[...] = _apply_act(acc + b_ref[...], act)

    out = pl.pallas_call(
        kernel,
        out_shape=jax.ShapeDtypeStruct((Mp, N), jnp.float32),
        grid=(1,),
        in_specs=[pl.BlockSpec((Mp, K), lambda i: (0, 0)),
                  pl.BlockSpec((K, N), lambda i: (0, 0)),
                  pl.BlockSpec((1, N), lambda i: (0, 0))],
        out_specs=pl.BlockSpec((Mp, N), lambda i: (0, 0)),
    )(a, w_t, bias2)
    return out[:M] if Mp != M else out


# --------------------------------------------------------------------------
# Fused 4-layer LSTM recurrence in ONE Pallas kernel.
#   NewModel8 runs self.lstm1 (2 layers) twice back to back and only uses
#   (l1 + l2)[:, -1, :], so all four recurrent layers are fused and only the
#   final (B, H) result is written out.  h/c states live in f32 VMEM scratch;
#   recurrence matmuls run with bf16 MXU operands, gate math stays f32.
# --------------------------------------------------------------------------
def _lstm4_kernel(xg_ref, wih1_ref, whh1_ref, wih2_ref, whh2_ref,
                  b1_ref, b2_ref, out_ref,
                  h1, c1, h2, c2, h3, c3, h4, c4):
    T = xg_ref.shape[0]
    H = h1.shape[1]
    for s in (h1, c1, h2, c2, h3, c3, h4, c4):
        s[...] = jnp.zeros_like(s)

    def cell(gates, h_sc, c_sc):
        i = jax.nn.sigmoid(gates[:, 0:H])
        f = jax.nn.sigmoid(gates[:, H:2 * H])
        g = jnp.tanh(gates[:, 2 * H:3 * H])
        o = jax.nn.sigmoid(gates[:, 3 * H:4 * H])
        c = f * c_sc[...] + i * g
        h = o * jnp.tanh(c)
        c_sc[...] = c
        h_sc[...] = h
        return h

    def rdot(h, w_ref):
        return jnp.dot(h.astype(jnp.bfloat16), w_ref[...],
                       preferred_element_type=jnp.float32)

    def step(t, carry):
        xg_t = xg_ref[pl.ds(t, 1)][0]                          # (B, 4H) f32
        # first lstm1 call, layer 1 / layer 2
        g1 = xg_t + rdot(h1[...], whh1_ref)
        h1n = cell(g1, h1, c1)
        g2 = b2_ref[...] + rdot(h1n, wih2_ref) + rdot(h2[...], whh2_ref)
        h2n = cell(g2, h2, c2)
        # second lstm1 call (same weights), input = output of first call
        g3 = b1_ref[...] + rdot(h2n, wih1_ref) + rdot(h3[...], whh1_ref)
        h3n = cell(g3, h3, c3)
        g4 = b2_ref[...] + rdot(h3n, wih2_ref) + rdot(h4[...], whh2_ref)
        cell(g4, h4, c4)
        return carry

    jax.lax.fori_loop(0, T, step, 0, unroll=4)
    out_ref[...] = h2[...] + h4[...]           # (l1 + l2)[:, -1, :]


def fused_double_lstm(x, p):
    """x: (B, T, I).  Runs lstm1 twice (as NewModel8.forward does) and returns
    (lstm1_out + lstm2_out)[:, -1, :] of shape (B, H), f32."""
    B, T, I = x.shape
    H = p["whh1"].shape[0]
    # layer-1 input projection for the whole sequence (one well-shaped matmul)
    xg = _linear(x.reshape(B * T, I), p["wih1"], p["b1"])     # (B*T, 4H) f32
    xg = xg.reshape(B, T, 4 * H).transpose(1, 0, 2)           # (T, B, 4H)
    out = pl.pallas_call(
        _lstm4_kernel,
        out_shape=jax.ShapeDtypeStruct((B, H), jnp.float32),
        grid=(1,),
        in_specs=[pl.BlockSpec((T, B, 4 * H), lambda i: (0, 0, 0)),
                  pl.BlockSpec((I, 4 * H), lambda i: (0, 0)),
                  pl.BlockSpec((H, 4 * H), lambda i: (0, 0)),
                  pl.BlockSpec((H, 4 * H), lambda i: (0, 0)),
                  pl.BlockSpec((H, 4 * H), lambda i: (0, 0)),
                  pl.BlockSpec((1, 4 * H), lambda i: (0, 0)),
                  pl.BlockSpec((1, 4 * H), lambda i: (0, 0))],
        out_specs=pl.BlockSpec((B, H), lambda i: (0, 0)),
        scratch_shapes=[pltpu.VMEM((B, H), jnp.float32)] * 8,
        compiler_params=pltpu.CompilerParams(
            dimension_semantics=("arbitrary",)),
    )(xg, p["wih1"], p["whh1"], p["wih2"], p["whh2"],
      p["b1"].reshape(1, 4 * H), p["b2"].reshape(1, 4 * H))
    return out


# --------------------------------------------------------------------------
# Conv2d: im2col (NCHW, lane-dense M) + Pallas matmul.
# --------------------------------------------------------------------------
def conv2d(x, w, b, stride=(1, 1), padding=(0, 0), act="none",
           out_dtype=jnp.bfloat16):
    """x: (N, Cin, H, W); w: PyTorch layout (Cout, Cin, kh, kw)."""
    Cout, Cin, kh, kw = w.shape
    sh, sw = stride
    ph, pw = padding
    N = x.shape[0]
    x = x.astype(jnp.bfloat16)
    if ph or pw:
        x = jnp.pad(x, ((0, 0), (0, 0), (ph, ph), (pw, pw)))
    Hp, Wp = x.shape[2], x.shape[3]
    oh = (Hp - kh) // sh + 1
    ow = (Wp - kw) // sw + 1
    cols = []
    for i in range(kh):
        for j in range(kw):
            cols.append(x[:, :, i:i + sh * oh:sh, j:j + sw * ow:sw])
    col = jnp.stack(cols, axis=2)                       # (N, Cin, kh*kw, oh, ow)
    col = col.reshape(N, Cin * kh * kw, oh * ow)        # (N, K, M) -- no transpose
    wmat = w.reshape(Cout, Cin * kh * kw)
    out = _conv_matmul(col, wmat, b, act=act, out_dtype=out_dtype)
    return out.reshape(N, Cout, oh, ow)


# --------------------------------------------------------------------------
# ConvTranspose2d with ALL sub-pixel phases fused into ONE matmul:
#   each flipped sub-kernel is zero-padded onto a shared stride-1 window of
#   size (MH, MW), concatenated along Cout (Cout_eff = sh*sw*Cout), a single
#   im2col + Pallas matmul computes all phases, and the result is interleaved
#   once (pixel shuffle).
# --------------------------------------------------------------------------
def _convT_phase_geom(k, s, p):
    a_l, d_l, m_l = [], [], []
    for r in range(s):
        a = (r + p) % s
        d = (r + p) // s
        m = max((k - 1 - a) // s + 1, 0)
        a_l.append(a); d_l.append(d); m_l.append(m)
    valid = [r for r in range(s) if m_l[r] > 0]
    off = min(d_l[r] - (m_l[r] - 1) for r in valid)
    span = max(d_l[r] for r in valid) - off + 1
    return a_l, d_l, m_l, off, span


def conv_transpose2d(x, w, b, stride=(1, 1), padding=(0, 0), act="none",
                     out_dtype=jnp.bfloat16):
    """x: (N, Cin, Hi, Wi); w: PyTorch ConvTranspose2d layout (Cin, Cout, kh, kw)."""
    Cin, Cout, kh, kw = w.shape
    sh, sw = stride
    ph, pw = padding
    N, _, Hi, Wi = x.shape
    Ho = (Hi - 1) * sh + kh - 2 * ph
    Wo = (Wi - 1) * sw + kw - 2 * pw
    U = -(-Ho // sh)
    V = -(-Wo // sw)

    ah, dh, mh, off_h, MH = _convT_phase_geom(kh, sh, ph)
    aw, dw, mw, off_w, MW = _convT_phase_geom(kw, sw, pw)

    # Fused weight: phase-major OIHW layout (sh*sw*Cout, Cin, MH, MW).
    w_oihw = jnp.transpose(w, (1, 0, 2, 3)).astype(jnp.float32)
    rows = []
    for r in range(sh):
        cols_ = []
        for c in range(sw):
            wk = jnp.zeros((Cout, Cin, MH, MW), jnp.float32)
            for qh in range(MH):
                m_h = dh[r] - off_h - qh
                if not (0 <= m_h < mh[r]):
                    continue
                for qw in range(MW):
                    m_w = dw[c] - off_w - qw
                    if not (0 <= m_w < mw[c]):
                        continue
                    wk = wk.at[:, :, qh, qw].set(
                        w_oihw[:, :, ah[r] + sh * m_h, aw[c] + sw * m_w])
            cols_.append(wk)
        rows.append(jnp.stack(cols_, 0))
    wf = jnp.stack(rows, 0).reshape(sh * sw * Cout, Cin, MH, MW)
    bf = jnp.tile(b, sh * sw)

    # One zero-padded input window shared by all phases (pad/cast once).
    lo_h, hi_h = off_h, off_h + U + MH - 2          # inclusive input-row range
    lo_w, hi_w = off_w, off_w + V + MW - 2
    pad_t, pad_b = max(0, -lo_h), max(0, hi_h - (Hi - 1))
    pad_l, pad_r = max(0, -lo_w), max(0, hi_w - (Wi - 1))
    xw = jnp.pad(x.astype(jnp.bfloat16),
                 ((0, 0), (0, 0), (pad_t, pad_b), (pad_l, pad_r)))
    xw = xw[:, :, lo_h + pad_t:hi_h + pad_t + 1, lo_w + pad_l:hi_w + pad_l + 1]

    out = conv2d(xw, wf, bf, (1, 1), (0, 0), act=act, out_dtype=out_dtype)
    out = out.reshape(N, sh, sw, Cout, U, V)
    out = out.transpose(0, 3, 4, 1, 5, 2).reshape(N, Cout, U * sh, V * sw)
    return out[:, :, :Ho, :Wo]


# --------------------------------------------------------------------------
# Model configuration (matches NewModel8).
# --------------------------------------------------------------------------
ENC_LSTM_CFG = [  # (cin, cout, (kh,kw), (sh,sw), (ph,pw))
    (3, 16, (5, 5), (2, 2), (2, 2)),
    (16, 32, (3, 3), (2, 2), (1, 1)),
    (32, 48, (4, 3), (2, 1), (1, 1)),
    (48, 64, (8, 3), (4, 1), (2, 1)),
    (64, 64, (7, 3), (1, 1), (0, 1)),
]
ENC_CNN_CFG = [
    (3, 8, (5, 5), (2, 2), (2, 2)),
    (8, 16, (4, 4), (2, 2), (1, 1)),
    (16, 32, (5, 5), (2, 2), (2, 2)),
    (32, 32, (4, 4), (2, 2), (1, 1)),
]
DEC_LSTM_CFG = [  # (cin, cout, k, s, p, act)
    (64, 64, (7, 3), (1, 1), (0, 1), "relu"),
    (64, 48, (8, 3), (4, 1), (2, 1), "relu"),
    (48, 32, (4, 3), (2, 1), (1, 1), "relu"),
    (32, 16, (2, 2), (2, 2), (0, 0), "relu"),
    (16, 3, (4, 4), (2, 2), (1, 1), "sigmoid"),
]
DEC_CNN_CFG = [
    (32, 16, (4, 4), (2, 2), (1, 1), "relu"),
    (16, 8, (6, 6), (4, 4), (1, 1), "relu"),
    (8, 3, (4, 4), (2, 2), (1, 1), "sigmoid"),
]
HIDDEN = 128


def init_params(key):
    keys = jax.random.split(key, 128)
    ki = iter(keys)

    def nk():
        return next(ki)

    def conv_wb(co, ci, kh, kw):
        fan = ci * kh * kw
        w = jax.random.normal(nk(), (co, ci, kh, kw), jnp.float32) * (fan ** -0.5)
        b = jax.random.normal(nk(), (co,), jnp.float32) * 0.01
        return (w.astype(jnp.bfloat16), b)               # bf16 MXU weights

    def convT_wb(ci, co, kh, kw):
        fan = ci * kh * kw
        w = jax.random.normal(nk(), (ci, co, kh, kw), jnp.float32) * (fan ** -0.5)
        b = jax.random.normal(nk(), (co,), jnp.float32) * 0.01
        return (w.astype(jnp.bfloat16), b)

    def lin_wb(fin, fout):
        w = jax.random.normal(nk(), (fout, fin), jnp.float32) * (fin ** -0.5)
        b = jax.random.normal(nk(), (fout,), jnp.float32) * 0.01
        return (w.T.astype(jnp.bfloat16), b)             # stored as (K, N) bf16

    def lstm_two_layer(fin, H):
        s = H ** -0.5

        def layer(fin_):
            w_ih = jax.random.normal(nk(), (4 * H, fin_), jnp.float32) * s
            w_hh = jax.random.normal(nk(), (4 * H, H), jnp.float32) * s
            b_ih = jax.random.normal(nk(), (4 * H,), jnp.float32) * s
            b_hh = jax.random.normal(nk(), (4 * H,), jnp.float32) * s
            return (w_ih.T.astype(jnp.bfloat16),         # (I, 4H) bf16
                    w_hh.T.astype(jnp.bfloat16),         # (H, 4H) bf16 recurrence
                    (b_ih + b_hh).astype(jnp.float32))

        wih1, whh1, b1 = layer(fin)
        wih2, whh2, b2 = layer(H)
        return {"wih1": wih1, "whh1": whh1, "b1": b1,
                "wih2": wih2, "whh2": whh2, "b2": b2}

    params = {
        "enc1": [conv_wb(co, ci, kh, kw) for (ci, co, (kh, kw), _, _) in ENC_LSTM_CFG],
        "enc2": [conv_wb(co, ci, kh, kw) for (ci, co, (kh, kw), _, _) in ENC_LSTM_CFG],
        "enc3": [conv_wb(co, ci, kh, kw) for (ci, co, (kh, kw), _, _) in ENC_CNN_CFG],
        "dec1": [convT_wb(ci, co, kh, kw) for (ci, co, (kh, kw), _, _, _) in DEC_LSTM_CFG],
        "dec2": [convT_wb(ci, co, kh, kw) for (ci, co, (kh, kw), _, _, _) in DEC_LSTM_CFG],
        "dec3": [convT_wb(ci, co, kh, kw) for (ci, co, (kh, kw), _, _, _) in DEC_CNN_CFG],
        "conv": [conv_wb(32, 32, 4, 4), conv_wb(64, 32, 3, 3)],
        "fc1": [lin_wb(3648, 512), lin_wb(512, 64)],
        "fc2": lin_wb(192, 9),
        "lstm1": lstm_two_layer(128, HIDDEN),
        # NOTE: attention1/attention2, lstm2, w1/w2/w3 exist in __init__ but are
        # never used in NewModel8.forward, so they are omitted here.
    }
    return params


def run_conv_stack(x, ps, cfg):
    for (w, b), (_, _, k, s, p) in zip(ps, cfg):
        x = conv2d(x, w, b, s, p, act="relu")
    return x


def run_convT_stack(x, ps, cfg):
    last = len(ps) - 1
    for idx, ((w, b), (_, _, k, s, p, act)) in enumerate(zip(ps, cfg)):
        od = jnp.float32 if idx == last else jnp.bfloat16
        x = conv_transpose2d(x, w, b, s, p, act=act, out_dtype=od)
    return x


def forward(params, x, batch_size):
    x = x.astype(jnp.bfloat16)
    x1 = x[0:batch_size]
    x2 = x[batch_size:2 * batch_size]
    x3 = x[2 * batch_size:3 * batch_size]

    enc1 = run_conv_stack(x1, params["enc1"], ENC_LSTM_CFG)   # (B, 64, 1, 56)
    enc2 = run_conv_stack(x2, params["enc2"], ENC_LSTM_CFG)   # (B, 64, 1, 56)
    enc3 = run_conv_stack(x3, params["enc3"], ENC_CNN_CFG)    # (B, 32, 14, 14)

    dec1 = run_convT_stack(enc1, params["dec1"], DEC_LSTM_CFG)  # (B, 3, 224, 224)
    dec2 = run_convT_stack(enc2, params["dec2"], DEC_LSTM_CFG)
    dec3 = run_convT_stack(enc3, params["dec3"], DEC_CNN_CFG)

    # encoder_x.transpose(3, 1).squeeze(2)
    enc12 = jnp.transpose(enc1, (0, 3, 2, 1))[:, :, 0, :]     # (B, 56, 64)
    enc22 = jnp.transpose(enc2, (0, 3, 2, 1))[:, :, 0, :]     # (B, 56, 64)

    # self.conv: Conv(32,32,4,2) ReLU, MaxPool(2,2), ReLU, Conv(32,64,3,1) ReLU, Flatten
    (wa, ba), (wb, bb) = params["conv"]
    c = conv2d(enc3, wa, ba, (2, 2), (0, 0), act="relu")      # (B, 32, 6, 6)
    Nc, Cc, Hc, Wc = c.shape
    c = c.reshape(Nc, Cc, Hc // 2, 2, Wc // 2, 2).max(axis=(3, 5))  # MaxPool2d(2,2)
    c = jnp.maximum(c, 0)
    c = conv2d(c, wb, bb, (1, 1), (0, 0), act="relu")         # (B, 64, 1, 1)
    enc31 = c.reshape(Nc, -1)                                 # (B, 64)
    enc32 = enc31[:, None, :]                                 # (B, 1, 64)

    out1 = jnp.concatenate([enc12, enc22], axis=2)            # (B, 56, 128)
    out2 = jnp.concatenate([enc22, enc32], axis=1)            # (B, 57, 64)

    # forward uses self.lstm1 for BOTH calls (lstm2 weights unused);
    # both 2-layer passes + the (l1 + l2)[:, -1] reduction are fused.
    out_12 = fused_double_lstm(out1, params["lstm1"])         # (B, 128)

    out_13 = out2.reshape(-1, 3648)
    (w1t, b1), (w2t, b2) = params["fc1"]
    out_13 = _linear(out_13, w1t, b1)                         # (B, 512)
    out_13 = _linear(out_13, w2t, b2)                         # (B, 64)

    out = jnp.concatenate([out_12, out_13], axis=1)           # (B, 192)
    wft, bft = params["fc2"]
    out = _linear(out, wft, bft)                              # (B, 9)

    return (dec1.astype(jnp.float32), dec2.astype(jnp.float32),
            dec3.astype(jnp.float32), out)


# --------------------------------------------------------------------------
# Small correctness self-check of the conv / fused convT lowering.
# --------------------------------------------------------------------------
def _conv_ref(x, w, b, stride, padding, act):
    xb = x.astype(jnp.bfloat16).astype(jnp.float32)
    wb = w.astype(jnp.bfloat16).astype(jnp.float32)
    out = jax.lax.conv_general_dilated(
        xb, wb, window_strides=stride,
        padding=((padding[0], padding[0]), (padding[1], padding[1])),
        dimension_numbers=("NCHW", "OIHW", "NCHW"),
        precision=jax.lax.Precision.HIGHEST)
    return _apply_act(out + b.reshape(1, -1, 1, 1), act)


def _convT_ref(x, w, b, stride, padding, act):
    sh, sw = stride
    ph, pw = padding
    kh, kw = w.shape[2], w.shape[3]
    xb = x.astype(jnp.bfloat16).astype(jnp.float32)
    wb = jnp.flip(w.astype(jnp.bfloat16).astype(jnp.float32), (2, 3))
    wb = wb.transpose(1, 0, 2, 3)
    out = jax.lax.conv_general_dilated(
        xb, wb, window_strides=(1, 1),
        padding=((kh - 1 - ph, kh - 1 - ph), (kw - 1 - pw, kw - 1 - pw)),
        lhs_dilation=(sh, sw),
        dimension_numbers=("NCHW", "OIHW", "NCHW"),
        precision=jax.lax.Precision.HIGHEST)
    return _apply_act(out + b.reshape(1, -1, 1, 1), act)


def _self_check():
    k = jax.random.PRNGKey(42)
    ks = jax.random.split(k, 6)
    x = jax.random.normal(ks[0], (2, 5, 9, 11), jnp.float32)
    w = jax.random.normal(ks[1], (7, 5, 3, 4), jnp.float32) * 0.2
    b = jax.random.normal(ks[2], (7,), jnp.float32) * 0.1
    got = conv2d(x, w, b, (2, 1), (1, 2), act="relu", out_dtype=jnp.float32)
    ref = _conv_ref(x, w, b, (2, 1), (1, 2), "relu")
    assert bool(jnp.allclose(got, ref, atol=2e-2, rtol=2e-2)), "conv2d mismatch"

    xt = jax.random.normal(ks[3], (2, 6, 5, 7), jnp.float32)
    wt = jax.random.normal(ks[4], (6, 4, 4, 6), jnp.float32) * 0.2
    bt = jax.random.normal(ks[5], (4,), jnp.float32) * 0.1
    for stride, pad in [((2, 2), (1, 1)), ((4, 2), (1, 0)), ((1, 1), (0, 1))]:
        got = conv_transpose2d(xt, wt, bt, stride, pad, act="sigmoid",
                               out_dtype=jnp.float32)
        ref = _convT_ref(xt, wt, bt, stride, pad, "sigmoid")
        assert bool(jnp.allclose(got, ref, atol=2e-2, rtol=2e-2)), (
            "conv_transpose2d mismatch for stride=%s pad=%s" % (stride, pad))


if __name__ == "__main__":
    BATCH = 2
    _self_check()

    key = jax.random.PRNGKey(0)
    pkey, xkey = jax.random.split(key)
    params = init_params(pkey)
    # Input spatial size is architecturally fixed to 224x224 by the module.
    x = jax.random.normal(xkey, (3 * BATCH, 3, 224, 224), jnp.float32)

    fwd = jax.jit(functools.partial(forward, batch_size=BATCH))
    dec1, dec2, dec3, out = fwd(params, x)
    jax.block_until_ready((dec1, dec2, dec3, out))

    assert dec1.shape == (BATCH, 3, 224, 224)
    assert dec2.shape == (BATCH, 3, 224, 224)
    assert dec3.shape == (BATCH, 3, 224, 224)
    assert out.shape == (BATCH, 9)
    assert bool(jnp.all(jnp.isfinite(out)))
    assert bool(jnp.all((dec1 >= 0) & (dec1 <= 1)))  # sigmoid outputs
    print("KERNEL_OK")
</pallas_src>

<mosaic_0001>
module attributes {stable_mosaic.version = 11 : i64} {
  func.func @kernel(%arg0: i32, %arg1: i32, %arg2: memref<7x60xbf16, #tpu.memory_space<vmem>>, %arg3: memref<7x1xf32, #tpu.memory_space<vmem>>, %arg4: memref<1x60x128xbf16, #tpu.memory_space<vmem>>, %arg5: memref<1x7x128xf32, #tpu.memory_space<vmem>>) attributes {dimension_semantics = [#tpu.dimension_semantics<parallel>, #tpu.dimension_semantics<parallel>], iteration_bounds = array<i64: 2, 1>, scalar_prefetch = 0 : i64, scratch_operands = 0 : i64, tpu.core_type = #tpu.core_type<tc>, window_params = [{pipeline_mode = #tpu.pipeline_mode<synchronous>, transform_indices = @transform_0, window_bounds = array<i64: 7, 60>}, {pipeline_mode = #tpu.pipeline_mode<synchronous>, transform_indices = @transform_1, window_bounds = array<i64: 7, 1>}, {transform_indices = @transform_2, window_bounds = array<i64: 1, 60, 128>}, {transform_indices = @transform_3, window_bounds = array<i64: 1, 7, 128>}]} {
    %c0 = arith.constant 0 : index
    %c0_0 = arith.constant 0 : index
    %0 = vector.load %arg2[%c0, %c0_0] : memref<7x60xbf16, #tpu.memory_space<vmem>>, vector<7x60xbf16>
    %c0_1 = arith.constant 0 : index
    %c0_2 = arith.constant 0 : index
    %c0_3 = arith.constant 0 : index
    %1 = vector.load %arg4[%c0_1, %c0_2, %c0_3] : memref<1x60x128xbf16, #tpu.memory_space<vmem>>, vector<1x60x128xbf16>
    %2 = vector.shape_cast %1 : vector<1x60x128xbf16> to vector<60x128xbf16>
    %cst = arith.constant dense<0.000000e+00> : vector<7x128xf32>
    %3 = tpu.matmul %0, %2, %cst {dimension_numbers = #tpu.dot_dimension_numbers<[1], [0], [0], [1], [0, 0, 1, 1], [], []>} : vector<7x60xbf16>, vector<60x128xbf16>, vector<7x128xf32> -> vector<7x128xf32>
    %c0_4 = arith.constant 0 : index
    %c0_5 = arith.constant 0 : index
    %4 = vector.load %arg3[%c0_4, %c0_5] : memref<7x1xf32, #tpu.memory_space<vmem>>, vector<7x1xf32>
    %5 = vector.broadcast %4 : vector<7x1xf32> to vector<7x128xf32>
    %6 = arith.addf %3, %5 : vector<7x128xf32>
    %cst_6 = arith.constant 0.000000e+00 : f32
    %7 = vector.broadcast %cst_6 : f32 to vector<7x128xf32>
    %8 = arith.maximumf %6, %7 : vector<7x128xf32>
    %c0_7 = arith.constant 0 : index
    %c0_8 = arith.constant 0 : index
    %c0_9 = arith.constant 0 : index
    %9 = vector.load %arg5[%c0_7, %c0_8, %c0_9] : memref<1x7x128xf32, #tpu.memory_space<vmem>>, vector<1x7x128xf32>
    %10 = vector.shape_cast %9 : vector<1x7x128xf32> to vector<7x128xf32>
    %11 = vector.shape_cast %8 : vector<7x128xf32> to vector<1x7x128xf32>
    tpu.vector_store %arg5[%c0_7, %c0_8, %c0_9], %11 {strides = array<i32>} : memref<1x7x128xf32, #tpu.memory_space<vmem>>, vector<1x7x128xf32>,
    return
  }
  func.func @transform_0(%arg0: i32, %arg1: i32) -> (i32, i32) {
    %c0_i32 = arith.constant 0 : i32
    %c0_i32_0 = arith.constant 0 : i32
    %c0_i32_1 = arith.constant 0 : i32
    return %c0_i32, %c0_i32_0 : i32, i32
  }
  func.func @transform_1(%arg0: i32, %arg1: i32) -> (i32, i32) {
    %c0_i32 = arith.constant 0 : i32
    %c0_i32_0 = arith.constant 0 : i32
    %c0_i32_1 = arith.constant 0 : i32
    return %c0_i32, %c0_i32_0 : i32, i32
  }
  func.func @transform_2(%arg0: i32, %arg1: i32) -> (i32, i32, i32) {
    %c0_i32 = arith.constant 0 : i32
    %c0_i32_0 = arith.constant 0 : i32
    return %arg0, %c0_i32, %arg1 : i32, i32, i32
  }
  func.func @transform_3(%arg0: i32, %arg1: i32) -> (i32, i32, i32) {
    %c0_i32 = arith.constant 0 : i32
    %c0_i32_0 = arith.constant 0 : i32
    return %arg0, %c0_i32, %arg1 : i32, i32, i32
  }
}

</mosaic_0001>

<bundles_post_ra>
// kernel: tpu_custom_call.1
= control target key start
LH: loop header
LB: loop body
LE: loop exit
PB: predicated region body
PF: predicated region fallthrough
CT: control target
= control target key end

     0   :  { %s478_s12 = smov 0   ;;  %s480_s13 = smov 0   ;;  %s517_s0 = inlined_call_operand.vmem [shape: bf16[7,60], index: 0, kind: input, shape index: {}]   ;;  %s518_s1 = inlined_call_operand.vmem [shape: f32[7,1], index: 1, kind: input, shape index: {}]   ;;  %s519_s2 = inlined_call_operand.vmem [shape: bf16[2,60,128], index: 2, kind: input, shape index: {}]   ;;  %s520_s3 = inlined_call_operand.vmem [shape: f32[2,7,128], index: 3, kind: output, shape index: {}]  }
   0x1   :  { %s482_s14 = smov 0  }
   0x2 LB: > { %s25_s15 = sadd.s32 1, %s449_s13  ;;  %p370_p0 = scmp.ge.s32.totalorder %s453_s14, 1  ;;  %s453_s14 = sphi %s482_s14, %s13_s14   ;;  %s449_s13 = sphi %s480_s13, %s522_s13   ;;  %s445_s12 = sphi %s478_s12, %s521_s12  }
   0x3   : > { %p27_p1 = scmp.ge.s32.totalorder %s25_s15, 2  ;;  %p156_p2 = scmp.lt.s32.totalorder %s453_s14, 3 }
   0x5   : > { %s524_s15 = smov (%p27_p1, %s25_s15), 0  ;;  %p157_p3 = pnand %p370_p0, %p156_p2 }
   0x6   : > { %p185_p4 = scmp.lt.s32.totalorder (!%p157_p3), %s445_s12, 1  ;;  %v455_v0 = vmov (!%p157_p3), 0.0   ;;  %vm456_vm0 = vmmov (!%p157_p3), 0   ;;  %v210_v1 = vld [vmem:[%s518_s1] sm:$0x7f] (!%p157_p3)  ;;  %v457_v2 = vmov (!%p157_p3), 0  }
   0x7   : > { %160 = sbr.rel (%p157_p3) target bundleno = 250 (0xfa), region = 32  ;;  %387 = vmatprep.subr.bf16.mxu0 (!%p157_p3), %v455_v0  ;;  %395 = vmatprep.mubr.msk.bf16.mxu0 (!%p157_p3), %vm456_vm0, %v455_v0  ;;  %vm243_vm1 = vcmask (!%p157_p3), 1045504   ;;  %v201_v8 = vld [vmem:[%s517_s0] sm:$0xf] (!%p157_p3)  ;;  %vm239_vm2 = vcmask (!%p157_p3), 490496  }
   0x8   : > { %426 = vset.pattern.permute.xlu0 (!%p157_p3), %v457_v2 }
   0x9   : > { %213 = vperm.xlu0 (!%p157_p3), %426, %v210_v1  }
   0xe   : > { %s526_s12 = smov (!%p185_p4, %s445_s12), 1 }
   0xf   : > { %s381_s18 = sshll.u32 %s526_s12, 5  ;;  %s373_s24 = sshll.u32 %s526_s12, 3 }
  0x10   : > { %s192_s21 = scalar_lea.vmem %s519_s2, %s381_s18  ;;  %s199_s27 = scalar_lea.vmem %s520_s3, %s373_s24 }
  0x11   : > { %v427_v3 = vld [vmem:[%s192_s21] sm:$0xff]   ;;  %v428_v4 = vld [vmem:[%s192_s21 + $0x8] sm:$0xff]   ;;  %v429_v5 = vld [vmem:[%s192_s21 + $0x10] sm:$0xff]  }
  0x12   : > { %388 = vmatpush3.bf16.msra.mxu0 %v427_v3  ;;  %v430_v6 = vld [vmem:[%s192_s21 + $0x18] sm:$0x3f]  }
  0x13   : > { %389 = vmatprep.subr.bf16.mxu0 %v455_v0  ;;  %v245_v7 = vsel %vm243_vm1, %v430_v6, 0 }
  0x16   : > { %390 = vmatpush3.bf16.msra.mxu0 %v428_v4 }
  0x17   : > { %391 = vmatprep.subr.bf16.mxu0 %v455_v0 }
  0x1a   : > { %392 = vmatpush3.bf16.msra.mxu0 %v429_v5 }
  0x1b   : > { %393 = vmatprep.subr.bf16.mxu0 %v455_v0 }
  0x1e   : > { %394 = vmatpush3.bf16.msra.mxu0 %v245_v7 }
  0x21   : > { %396 = vmatmul.mubr.msk.bf16.vlgmr.msra.gmra.mrb[0].mxu0 %vm239_vm2, %v201_v8 }
  0x88   : > { %v214_v9 = vpop.permute.xlu0 %213 }
  0xf4   : > { %v281_v10 = vpop.f32.mrb[0].mxu0 }
  0xf5   : > { %v282_v11 = vadd.f32 %v281_v10, %v214_v9  ;;  %v397_v12 = vpop.f32.mrb[1].mxu0 }
  0xf6   : > { %v284_v13 = vpop.f32.mrb[2].mxu0 }
  0xf7   : > { %v287_v14 = vmax.f32 %v282_v11, 0.0  ;;  %v398_v15 = vpop.f32.mrb[3].mxu0 }
  0xf9   : > { %288 = vst [vmem:[%s199_s27] sm:$0x7f] %v287_v14 }
  0xfa PF: > { %s13_s14 = sadd.s32 1, %s453_s14   ;;  %s521_s12 = smov %s449_s13 }
  0xfb   : > { %p10_p5 = scmp.ge.s32.totalorder %s13_s14, 4   ;;  %s522_s13 = smov %s524_s15 }
  0xfd   :  { %12 = sbr.rel (!%p10_p5) target bundleno = 2 (0x2), region = 62 }

</bundles_post_ra>
